<compile_context>
chip_gen: v7x
topology: tpu7x:2x2x1
jax: 0.10.0
libtpu: 0.0.40
codegen_flags: <defaults>
</compile_context>

<pallas_src>
import functools

import jax
import jax.numpy as jnp
from jax.experimental import pallas as pl
from jax.experimental.pallas import tpu as pltpu


# ----------------------------- kernel 1: covariance -----------------------------
def _covariance_kernel(s_ref, cov_ref):
    """All support classes in one step (stage is trivially small -> grid=(1,)).

    s_ref  : (way, C, Ns)   channel-major support activations, Ns = Bs*h*w
    cov_ref: (way*C, C)     stacked per-class covariance matrices
    """
    s = s_ref[...].astype(jnp.float32)                      # centering math in f32
    way, c, ns = s.shape

    mean = jnp.sum(s, axis=2, keepdims=True) * (1.0 / ns)   # per-(class, channel) mean
    xc = (s - mean).astype(s_ref.dtype)                     # matmul operand: native dtype

    # Fused shot+spatial contraction: `way` matmuls with K = Bs*hw, f32 accumulation.
    cov = jnp.einsum('wcs,wds->wcd', xc, xc,
                     preferred_element_type=jnp.float32) * (1.0 / (ns - 1))

    # Emit already stacked as (way*C, C) via `way` static stores (no reshape needed).
    for j in range(way):                                    # static, way is tiny (3-5)
        cov_ref[j * c:(j + 1) * c, :] = cov[j].astype(cov_ref.dtype)


# ----------------------------- kernel 2: similarity -----------------------------
def _similarity_kernel(q_ref, cov_ref, o_ref, *, hw):
    """One tile of queries per grid step; (b, p) stays folded on the lane axis.

    q_ref  : (1, C, N)      channel-major query tile, N = tile_b*hw
    cov_ref: (way*C, C)     stacked covariance matrices (shared matmul weights)
    o_ref  : (1, way, N)    lane-dense output block (full-lane-width row stores)
    """
    q = q_ref[0].astype(jnp.float32)                        # (C, N)
    c, n = q.shape
    way = o_ref.shape[1]
    tb = n // hw
    op_dtype = q_ref.dtype                                  # native matmul-operand dtype

    # --- per-(query, channel) L2 norm over each hw lane segment -------------------
    # 0/1 segment matrices from 2-D iota keep everything lane-folded: no in-kernel
    # reshape/transpose; the two K/N<=tb matmuls are negligible MXU work.
    r_idx = jax.lax.broadcasted_iota(jnp.int32, (n, tb), 0)          # flat lane index
    b_idx = jax.lax.broadcasted_iota(jnp.int32, (n, tb), 1)          # query index
    seg = ((r_idx >= b_idx * hw) & (r_idx < (b_idx + 1) * hw)
           ).astype(jnp.float32)                                      # (N, TB)
    b2 = jax.lax.broadcasted_iota(jnp.int32, (tb, n), 0)
    r2 = jax.lax.broadcasted_iota(jnp.int32, (tb, n), 1)
    seg_t = ((r2 >= b2 * hw) & (r2 < (b2 + 1) * hw)
             ).astype(jnp.float32)                                    # (TB, N)

    sumsq = jnp.dot(q * q, seg, preferred_element_type=jnp.float32)   # (C, TB)
    inv_norm = jax.lax.rsqrt(sumsq + 1e-30)          # eps guards all-zero channels
    qn = q * jnp.dot(inv_norm, seg_t, preferred_element_type=jnp.float32)  # (C, N)
    qn_op = qn.astype(op_dtype)

    # --- ONE shared-weight matmul per step: (way*C, C) @ (C, N), f32 accumulation --
    cov = cov_ref[...].astype(op_dtype)
    m = jnp.dot(cov, qn_op, preferred_element_type=jnp.float32)       # (way*C, N)

    # --- diag(qn^T cov_j qn): per-class channel reduction, full-lane-width stores --
    for j in range(way):                                   # static, way is tiny (3-5)
        mj = m[j * c:(j + 1) * c, :]                       # (C, N) static sublane slice
        sj = jnp.sum(mj * qn, axis=0, keepdims=True)       # (1, N) cross-sublane reduce
        o_ref[0:1, j:j + 1, :] = sj[None, :, :].astype(o_ref.dtype)


# --------------------------------- wrapper ---------------------------------
def _pick_tile_b(B, C, hw, way, q_itemsize, budget_bytes):
    """Largest divisor of B whose per-step VMEM footprint fits the budget."""
    def vmem_bytes(tb):
        n = tb * hw
        q_blk = 2 * C * n * q_itemsize          # double-buffered query block
        o_blk = 2 * way * n * 4                 # double-buffered f32 output block
        cov = 2 * way * C * C * 4
        m = way * C * n * 4                     # stacked matmul result (f32)
        work = 6 * C * n * 4 + 2 * n * tb * 4   # f32 working copies + segment matrices
        return q_blk + o_blk + cov + m + work

    for d in range(B, 0, -1):
        if B % d == 0 and vmem_bytes(d) <= budget_bytes:
            return d
    return 1


def cova_block(x1, x2_list, *, vmem_budget_bytes=12 << 20):
    """JAX/Pallas equivalent of CovaBlock.forward.

    x1     : (B, C, h, w) query batch
    x2_list: list (length=way) of (Bs, C, h, w) support sets
    returns: (B, 1, way*h*w) similarity map (matches the PyTorch output)
    """
    B, C, h, w = x1.shape
    hw = h * w
    way = len(x2_list)
    Bs = x2_list[0].shape[0]
    n_sup = Bs * hw

    # ---- support -> (way, C, Bs*hw), channel-major (one-time XLA layout plumbing)
    supp = jnp.stack(x2_list, axis=0).reshape(way, Bs, C, hw)
    supp = jnp.transpose(supp, (0, 2, 1, 3)).reshape(way, C, n_sup)

    cov = pl.pallas_call(
        _covariance_kernel,
        out_shape=jax.ShapeDtypeStruct((way * C, C), jnp.float32),
        grid=(1,),          # stage is ~0.1us of MXU work; splitting it is pure overhead
        in_specs=[pl.BlockSpec((way, C, n_sup), lambda i: (0, 0, 0))],
        out_specs=pl.BlockSpec((way * C, C), lambda i: (0, 0)),
        compiler_params=pltpu.CompilerParams(dimension_semantics=("arbitrary",)),
    )(supp)

    # ---- queries -> (n_tiles, C, tile_b*hw) channel-major tiles (layout plumbing)
    tile_b = _pick_tile_b(B, C, hw, way, x1.dtype.itemsize, vmem_budget_bytes)
    n_tiles = B // tile_b
    q = x1.reshape(n_tiles, tile_b, C, hw)
    q = jnp.transpose(q, (0, 2, 1, 3)).reshape(n_tiles, C, tile_b * hw)

    sim = pl.pallas_call(
        functools.partial(_similarity_kernel, hw=hw),
        out_shape=jax.ShapeDtypeStruct((n_tiles, way, tile_b * hw), jnp.float32),
        grid=(n_tiles,),
        in_specs=[
            pl.BlockSpec((1, C, tile_b * hw), lambda i: (i, 0, 0)),
            pl.BlockSpec((way * C, C), lambda i: (0, 0)),   # resident, loaded once
        ],
        out_specs=pl.BlockSpec((1, way, tile_b * hw), lambda i: (i, 0, 0)),
        compiler_params=pltpu.CompilerParams(dimension_semantics=("parallel",)),
    )(q, cov)

    # Untangle (n_tiles, way, tile_b, hw) -> (B, 1, way*hw): cheap XLA plumbing.
    sim = sim.reshape(n_tiles, way, tile_b, hw)
    sim = jnp.transpose(sim, (0, 2, 1, 3)).reshape(B, 1, way * hw)
    return sim


# ---------------------------- pure-JAX reference ----------------------------
def cova_block_ref(x1, x2_list):
    B, C, h, w = x1.shape
    covs = []
    for s in x2_list:
        Bs = s.shape[0]
        xs = jnp.transpose(s, (1, 0, 2, 3)).reshape(C, -1)
        xs = xs - jnp.mean(xs, axis=1, keepdims=True)
        covs.append(xs @ xs.T / (h * w * Bs - 1))
    outs = []
    for b in range(B):
        qs = x1[b].reshape(C, -1)
        qs = qs / jnp.linalg.norm(qs, axis=1, keepdims=True)
        row = []
        for cov in covs:
            td = qs.T @ cov @ qs
            row.append(jnp.diag(td))
        outs.append(jnp.concatenate(row)[None, :])
    return jnp.stack(outs, axis=0)                          # (B, 1, way*h*w)


if __name__ == "__main__":
    key = jax.random.PRNGKey(0)
    B, C, h, w = 2, 4, 4, 4        # query batch, channels, spatial
    way, Bs = 3, 5                 # num support classes, shots per class

    keys = jax.random.split(key, way + 1)
    x1 = jax.random.normal(keys[0], (B, C, h, w), dtype=jnp.float32)
    x2 = [jax.random.normal(k, (Bs, C, h, w), dtype=jnp.float32)
          for k in keys[1:]]

    out = jax.block_until_ready(cova_block(x1, x2))

    ref = cova_block_ref(x1, x2)
    assert out.shape == (B, 1, way * h * w), out.shape
    assert jnp.allclose(out, ref, atol=2e-3, rtol=2e-3), (
        float(jnp.max(jnp.abs(out - ref))))

    print("KERNEL_OK")
</pallas_src>

<mosaic_0001>
module attributes {stable_mosaic.version = 11 : i64} {
  func.func @_covariance_kernel(%arg0: i32, %arg1: memref<3x4x80xf32, #tpu.memory_space<vmem>>, %arg2: memref<12x4xf32, #tpu.memory_space<vmem>>) attributes {dimension_semantics = [#tpu.dimension_semantics<arbitrary>], iteration_bounds = array<i64: 1>, scalar_prefetch = 0 : i64, scratch_operands = 0 : i64, tpu.core_type = #tpu.core_type<tc>, window_params = [{pipeline_mode = #tpu.pipeline_mode<synchronous>, transform_indices = @transform_0, window_bounds = array<i64: 3, 4, 80>}, {pipeline_mode = #tpu.pipeline_mode<synchronous>, transform_indices = @transform_1, window_bounds = array<i64: 12, 4>}]} {
    %c0 = arith.constant 0 : index
    %c0_0 = arith.constant 0 : index
    %c0_1 = arith.constant 0 : index
    %0 = vector.load %arg1[%c0, %c0_0, %c0_1] : memref<3x4x80xf32, #tpu.memory_space<vmem>>, vector<3x4x80xf32>
    %cst = arith.constant dense<0.000000e+00> : vector<3x4xf32>
    %1 = vector.multi_reduction <add>, %0, %cst [2] : vector<3x4x80xf32> to vector<3x4xf32>
    %2 = vector.shape_cast %1 : vector<3x4xf32> to vector<3x4x1xf32>
    %cst_2 = arith.constant 1.250000e-02 : f32
    %3 = vector.broadcast %cst_2 : f32 to vector<3x4x1xf32>
    %4 = arith.mulf %2, %3 : vector<3x4x1xf32>
    %5 = vector.broadcast %4 : vector<3x4x1xf32> to vector<3x4x80xf32>
    %6 = arith.subf %0, %5 : vector<3x4x80xf32>
    "tpu.trace_start"() <{level = 10 : i32, message = "wcs,wds->wcd"}> : () -> ()
    %cst_3 = arith.constant dense<0.000000e+00> : vector<3x4x4xf32>
    %7 = tpu.matmul %6, %6, %cst_3 {dimension_numbers = #tpu.dot_dimension_numbers<[2], [2], [1], [1], [0, 0, 0, 1, 1, 1], [0], [0]>} : vector<3x4x80xf32>, vector<3x4x80xf32>, vector<3x4x4xf32> -> vector<3x4x4xf32>
    "tpu.trace_stop"() : () -> ()
    %cst_4 = arith.constant 0.0126582282 : f32
    %8 = vector.broadcast %cst_4 : f32 to vector<3x4x4xf32>
    %9 = arith.mulf %7, %8 : vector<3x4x4xf32>
    %10 = vector.extract_strided_slice %9 {offsets = [0, 0, 0], sizes = [1, 4, 4], strides = [1, 1, 1]} : vector<3x4x4xf32> to vector<1x4x4xf32>
    %11 = vector.shape_cast %10 : vector<1x4x4xf32> to vector<4x4xf32>
    %c0_5 = arith.constant 0 : index
    %c0_6 = arith.constant 0 : index
    %12 = vector.load %arg2[%c0_5, %c0_6] : memref<12x4xf32, #tpu.memory_space<vmem>>, vector<4x4xf32>
    tpu.vector_store %arg2[%c0_5, %c0_6], %11 {strides = array<i32>} : memref<12x4xf32, #tpu.memory_space<vmem>>, vector<4x4xf32>,
    %13 = vector.extract_strided_slice %9 {offsets = [1, 0, 0], sizes = [1, 4, 4], strides = [1, 1, 1]} : vector<3x4x4xf32> to vector<1x4x4xf32>
    %14 = vector.shape_cast %13 : vector<1x4x4xf32> to vector<4x4xf32>
    %c4 = arith.constant 4 : index
    %c0_7 = arith.constant 0 : index
    %15 = vector.load %arg2[%c4, %c0_7] : memref<12x4xf32, #tpu.memory_space<vmem>>, vector<4x4xf32>
    tpu.vector_store %arg2[%c4, %c0_7], %14 {strides = array<i32>} : memref<12x4xf32, #tpu.memory_space<vmem>>, vector<4x4xf32>,
    %16 = vector.extract_strided_slice %9 {offsets = [2, 0, 0], sizes = [1, 4, 4], strides = [1, 1, 1]} : vector<3x4x4xf32> to vector<1x4x4xf32>
    %17 = vector.shape_cast %16 : vector<1x4x4xf32> to vector<4x4xf32>
    %c8 = arith.constant 8 : index
    %c0_8 = arith.constant 0 : index
    %18 = vector.load %arg2[%c8, %c0_8] : memref<12x4xf32, #tpu.memory_space<vmem>>, vector<4x4xf32>
    tpu.vector_store %arg2[%c8, %c0_8], %17 {strides = array<i32>} : memref<12x4xf32, #tpu.memory_space<vmem>>, vector<4x4xf32>,
    return
  }
  func.func @transform_0(%arg0: i32) -> (i32, i32, i32) {
    %c0_i32 = arith.constant 0 : i32
    %c0_i32_0 = arith.constant 0 : i32
    %c0_i32_1 = arith.constant 0 : i32
    %c0_i32_2 = arith.constant 0 : i32
    return %c0_i32, %c0_i32_0, %c0_i32_1 : i32, i32, i32
  }
  func.func @transform_1(%arg0: i32) -> (i32, i32) {
    %c0_i32 = arith.constant 0 : i32
    %c0_i32_0 = arith.constant 0 : i32
    %c0_i32_1 = arith.constant 0 : i32
    return %c0_i32, %c0_i32_0 : i32, i32
  }
}

</mosaic_0001>

<bundles_post_ra>
// kernel: tpu_custom_call.1
= control target key start
LH: loop header
LB: loop body
LE: loop exit
PB: predicated region body
PF: predicated region fallthrough
CT: control target
= control target key end

     0   :  { %6 = vsyncpa [#allocation3], 0  ;;  %s329_s6 = smov [#allocation2]   ;;  %s368_s0 = inlined_call_operand.hbm [shape: f32[3,4,80], index: 0, kind: input, shape index: {}]   ;;  %s369_s1 = inlined_call_operand.vmem [shape: f32[12,4], index: 1, kind: output, shape index: {}]  }
   0x1   :  { %s12_s7 = sshll.u32 %s329_s6, 4  ;;  %s305_s10 = scalar_lea.hbm %s368_s0, 192  ;;  %s13_s7 = int_to_ptr.vmem [resolvable:$true] %s12_s7 }
   0x2   :  { %p306_p0 = scmp.ne.s32.totalorder %s368_s0, %s305_s10  ;;  %p309_p1 = scmp.lt.u32.totalorder %s305_s10, %s368_s0 }
   0x4   :  { %p311_p2 = pnand %p309_p1, %p306_p0 }
   0x6   :  { %314 = shalt.err (!%p311_p2)
}
   0x7   :  { %s315_s15 = scalar_lea.vmem %s13_s7, 192  ;;  %p320_p4 = scmp.lt.s32.totalorder %s13_s7, %s13_s7 }
   0x8   :  { %p316_p3 = scmp.ne.s32.totalorder %s13_s7, %s315_s15  ;;  %p321_p5 = scmp.lt.s32.totalorder %s315_s15, %s315_s15 }
   0xa   :  { %p322_p6 = por %p321_p5, %p320_p4 }
   0xc   :  { %p323_p7 = pnand %p322_p6, %p316_p3 }
   0xe   :  { %326 = shalt.err (!%p323_p7)
}
   0xf   :  { %s330_s16 = smov 64   ;;  %s331_s17 = smov 4  }
  0x10   :  { %18 = dma.hbm_to_vmem [thread:$0]  %s368_s0, 192, %s13_s7, [#allocation3], %s330_s16, %s330_s16, %s331_s17  }
  0x11   :  { %327 = dma.done.wait [#allocation3], 192  }
  0x12   :  { %328 = vsyncadd [#allocation3], 4294967104  ;;  %vm25_vm0 = vcmask 650240   ;;  %v22_v0 = vld [vmem:[#allocation2] sm:$0xf]  ;;  %v332_v6 = vmov 0.0  }
  0x13   :  { %v24_v1 = vld [vmem:[#allocation2 + $0x8] sm:$0xf]  ;;  %v23_v2 = vld [vmem:[#allocation2 + $0x4] sm:$0xf]  ;;  %v26_v3 = vsel %vm25_vm0, %v22_v0, 0.0  ;;  %285 = vmatprep.subr.mxu0 %v332_v6  ;;  %290 = vmatprep.subr.mxu1 %v332_v6  ;;  %vm333_vm1 = vmmov 0  }
  0x14   :  { %v32_v4 = vsel %vm25_vm0, %v24_v1, 0.0  ;;  %27 = vadd.xlane.f32.xlu0 %v26_v3  ;;  %v29_v5 = vsel %vm25_vm0, %v23_v2, 0.0  ;;  %287 = vmatprep.mubr.msk.f32.mxu0 %vm333_vm1, %v332_v6  ;;  %vm41_vm2 = vcmask 654336   ;;  %vm264_vm3 = vcmask 27648  }
  0x15   :  { %33 = vadd.xlane.f32.xlu1 %v32_v4  ;;  %292 = vmatprep.mubr.msk.f32.mxu1 %vm333_vm1, %v332_v6 }
  0x18   :  { %30 = vadd.xlane.f32.xlu0 %v29_v5 }
  0xa1   :  { %v28_v7 = vpop.xlane.xlu0 %27 }
  0xa2   :  { %v34_v8 = vpop.xlane.xlu1 %33  ;;  %v35_v9 = vmul.f32 0.0125, %v28_v7 }
  0xa3   :  { %v37_v10 = vmul.f32 0.0125, %v34_v8 }
  0xa4   :  { %v38_v11 = vsub.f32 %v22_v0, %v35_v9 }
  0xa5   :  { %v31_v12 = vpop.xlane.xlu0 %30  ;;  %v40_v13 = vsub.f32 %v24_v1, %v37_v10 }
  0xa6   :  { %v36_v14 = vmul.f32 0.0125, %v31_v12  ;;  %286 = vmatpush3.xpose.msk.msra.mxu0 %vm41_vm2, %v38_v11 }
  0xa7   :  { %295 = vmatprep.subr.mxu0 %v332_v6 }
  0xa8   :  { %v39_v15 = vsub.f32 %v23_v2, %v36_v14 }
  0xa9   :  { %288 = vmatmul.mubr.msk.f32.vlgmr.msra.gmra.mrb[0].mxu0 %vm41_vm2, %v38_v11 }
  0xaa   :  { %291 = vmatpush3.xpose.msk.msra.mxu1 %vm41_vm2, %v39_v15  ;;  %296 = vmatpush3.xpose.msk.msra.mxu0 %vm41_vm2, %v40_v13 }
  0xab   :  { %297 = vmatprep.mubr.msk.f32.mxu0 %vm333_vm1, %v332_v6 }
  0xad   :  { %293 = vmatmul.mubr.msk.f32.vlgmr.msra.gmra.mrb[0].mxu1 %vm41_vm2, %v39_v15  ;;  %298 = vmatmul.mubr.msk.f32.vlgmr.msra.gmra.mrb[2].mxu0 %vm41_vm2, %v40_v13 }
 0x17c   :  { %v111_v16 = vpop.f32.mrb[0].mxu0 }
 0x17d   :  { %v261_v17 = vmul.f32 0.012658228, %v111_v16  ;;  %v289_v18 = vpop.f32.mrb[1].mxu0 }
 0x17f   :  { %265 = vst.msk [vmem:[%s369_s1] sm:$0xf] %vm264_vm3, %v261_v17 }
 0x180   :  { %v184_v19 = vpop.f32.mrb[0].mxu1  ;;  %v257_v20 = vpop.f32.mrb[2].mxu0 }
 0x181   :  { %v262_v21 = vmul.f32 0.012658228, %v184_v19  ;;  %v263_v22 = vmul.f32 0.012658228, %v257_v20  ;;  %v294_v23 = vpop.f32.mrb[1].mxu1  ;;  %v299_v24 = vpop.f32.mrb[3].mxu0 }
 0x183   :  { %266 = vst.msk [vmem:[%s369_s1 + $0x4] sm:$0xf] %vm264_vm3, %v262_v21  ;;  %267 = vst.msk [vmem:[%s369_s1 + $0x8] sm:$0xf] %vm264_vm3, %v263_v22 }
 0x184   :  { %272 = vsyncpa [#allocation3], 1 }

</bundles_post_ra>
